<compile_context>
chip_gen: v5e
topology: v5e:2x2
jax: 0.10.0
libtpu: 0.0.40
codegen_flags: <defaults>
</compile_context>

<pallas_src>
import functools

import jax
import jax.numpy as jnp
from jax.experimental import pallas as pl
from jax.experimental.pallas import tpu as pltpu

hidden1_dim = 32
hidden2_dim = 16
EPS = 1e-5

_DECODE_TILE = 512            # decode output tile edge for large problems (HBM-write bound:
                              # bigger tiles amortize the ~0.35us per-grid-step overhead)
_SINGLE_BLOCK_MAX = 1024      # at/below this, pad to a multiple of 8 and use one tile
_DECODE_OUT_DTYPE = jnp.float32   # switch to jnp.bfloat16 to halve decode HBM writes if the
                                  # downstream tolerance allows (outputs are sigmoids in [0,1])


def _round_up(x, m):
    return ((x + m - 1) // m) * m


@functools.lru_cache(maxsize=1)
def _vmem_limit_bytes():
    """Per-generation scoped-VMEM limit: ~3/4 of physical, clamped to [32, 100] MiB."""
    cap = 64 * 1024 * 1024                       # conservative fallback (v7x physical)
    try:
        c = int(getattr(pltpu.get_tpu_info(), "vmem_capacity_bytes", 0))
        if c > 0:
            cap = c
    except Exception:
        pass
    return int(min(100 << 20, max(32 << 20, (cap * 3) // 4)))


def _vmem():
    return pl.BlockSpec(memory_space=pltpu.MemorySpace.VMEM)


def _smem():
    return pl.BlockSpec(memory_space=pltpu.MemorySpace.SMEM)


def _decode_tile(n):
    """(tile_edge, padded_size) for one decode output axis."""
    if n <= _SINGLE_BLOCK_MAX:
        p = _round_up(n, 8)
        return p, p
    return _DECODE_TILE, _round_up(n, _DECODE_TILE)


def _encoder_row_tile(p, limit):
    """Adjacency row-tile height: largest power of two <= 512 whose double-buffered bf16
    (Tr, P) tile fits the VMEM budget.  Always divides P (P is a multiple of 512 whenever
    it exceeds _SINGLE_BLOCK_MAX)."""
    if p <= _SINGLE_BLOCK_MAX:
        return p
    budget = max(4 << 20, min(limit - (8 << 20), 24 << 20))
    tr_cap = max(16, budget // (4 * p))          # 2 buffers x 2 bytes/elt
    tr = 16
    while tr * 2 <= min(512, tr_cap):
        tr *= 2
    return tr
    # TODO(synk): if P ever grows so large that even a 16-row adj tile overflows VMEM,
    #             add a second ("arbitrary") grid axis over adjacency columns with a
    #             VMEM accumulator.


# ---------------------------------------------------------------------------
# Kernel 1: "prep" — X @ W1 (feeds the GCN) and the full MLP branch -> Z_t.
# Single block: everything here is O(P * feature_dim), tiny next to the P^2 adj work.
# TODO(synk): row-tile this kernel too if N * graph_dim ever outgrows VMEM.
# ---------------------------------------------------------------------------
def _prep_kernel(x_ref, w1_ref, bi_ref, l1w_ref, l1b_ref, l2w_ref, l2b_ref,
                 wgt_ref, nt_ref, xw1_ref, zt_ref):
    f32 = jnp.float32
    bf16 = jnp.bfloat16
    # GCN input projection (bf16: it is only ever an MXU operand downstream).
    xw1_ref[...] = jnp.dot(x_ref[...], w1_ref[...],
                           preferred_element_type=f32).astype(bf16)
    # MLP reparameterization branch.
    h1 = jnp.dot(bi_ref[...], l1w_ref[...], preferred_element_type=f32) + l1b_ref[...]
    h2 = jax.nn.sigmoid(h1)
    h3 = jnp.dot(h2.astype(bf16), l2w_ref[...], preferred_element_type=f32) + l2b_ref[...]
    mu = jnp.maximum(wgt_ref[...] * h3, 0.0)     # relu(weight * h3)
    zt_ref[...] = nt_ref[...] * jnp.exp(mu) + mu


def _prep(Xp, W1, bip, l1w, l1b, l2w, l2b, wgtp, ntp, limit):
    Pn, Pm = Xp.shape[0], bip.shape[0]
    return pl.pallas_call(
        _prep_kernel,
        out_shape=(jax.ShapeDtypeStruct((Pn, hidden1_dim), jnp.bfloat16),
                   jax.ShapeDtypeStruct((Pm, hidden2_dim), jnp.float32)),
        in_specs=[_vmem()] * 9,
        out_specs=(_vmem(), _vmem()),
        compiler_params=pltpu.CompilerParams(vmem_limit_bytes=limit),
    )(Xp, W1, bip, l1w, l1b, l2w, l2b, wgtp, ntp)


# ---------------------------------------------------------------------------
# Kernel 2 (GCN pass A, row-tiled): HW_tile = (adj_tile @ XW1) @ Wms  (Wms = [Wm | Ws]).
# ---------------------------------------------------------------------------
def _gcn_hw_kernel(adj_ref, xw1_ref, wms_ref, hw_ref):
    h = jnp.dot(adj_ref[...], xw1_ref[...], preferred_element_type=jnp.float32)
    hw_ref[...] = jnp.dot(h.astype(jnp.bfloat16), wms_ref[...],
                          preferred_element_type=jnp.float32).astype(jnp.bfloat16)


def _gcn_pass_a(adj_bf, xw1, wms, Tr, limit):
    Pn = adj_bf.shape[0]
    return pl.pallas_call(
        _gcn_hw_kernel,
        out_shape=jax.ShapeDtypeStruct((Pn, 2 * hidden2_dim), jnp.bfloat16),
        grid=(Pn // Tr,),
        in_specs=[pl.BlockSpec((Tr, Pn), lambda i: (i, 0)),
                  pl.BlockSpec((Pn, hidden1_dim), lambda i: (0, 0)),
                  pl.BlockSpec((hidden1_dim, 2 * hidden2_dim), lambda i: (0, 0))],
        out_specs=pl.BlockSpec((Tr, 2 * hidden2_dim), lambda i: (i, 0)),
        compiler_params=pltpu.CompilerParams(
            dimension_semantics=("parallel",), vmem_limit_bytes=limit),
    )(adj_bf, xw1, wms)


# ---------------------------------------------------------------------------
# Kernel 3 (GCN pass B, row-tiled): ms_tile = adj_tile @ HW, then the reparameterization
# epilogue  Zc = noise_c * exp(logstd) + mean.
# ---------------------------------------------------------------------------
def _gcn_reparam_kernel(adj_ref, hw_ref, nc_ref, zc_ref):
    ms = jnp.dot(adj_ref[...], hw_ref[...], preferred_element_type=jnp.float32)
    mean = ms[:, :hidden2_dim]
    logstd = ms[:, hidden2_dim:]
    zc_ref[...] = nc_ref[...] * jnp.exp(logstd) + mean


def _gcn_pass_b(adj_bf, hw, ncp, Tr, limit):
    Pn = adj_bf.shape[0]
    return pl.pallas_call(
        _gcn_reparam_kernel,
        out_shape=jax.ShapeDtypeStruct((Pn, hidden2_dim), jnp.float32),
        grid=(Pn // Tr,),
        in_specs=[pl.BlockSpec((Tr, Pn), lambda i: (i, 0)),
                  pl.BlockSpec((Pn, 2 * hidden2_dim), lambda i: (0, 0)),
                  pl.BlockSpec((Tr, hidden2_dim), lambda i: (i, 0))],
        out_specs=pl.BlockSpec((Tr, hidden2_dim), lambda i: (i, 0)),
        compiler_params=pltpu.CompilerParams(
            dimension_semantics=("parallel",), vmem_limit_bytes=limit),
    )(adj_bf, hw, ncp)


# ---------------------------------------------------------------------------
# Kernel 4: tiled distance decoder: sigmoid( (1/(||zr - zc|| + eps)) / a - b ).
# Column operand is pre-transposed (lane-dense (16, P)); row/col squared norms are
# precomputed and passed as tiny inputs; EUP approx reciprocal.
# ---------------------------------------------------------------------------
def _decode_kernel(a_ref, b_ref, zr_ref, zcT_ref, rn_ref, cn_ref, out_ref):
    inv_a = 1.0 / a_ref[0]
    b = b_ref[0]
    gram = jnp.dot(zr_ref[...], zcT_ref[...], preferred_element_type=jnp.float32)
    d2 = jnp.maximum(rn_ref[...] + cn_ref[...] - 2.0 * gram, 0.0)
    d = jnp.sqrt(d2)
    inv = pl.reciprocal(d + EPS, approx=True)            # EUP slot
    out_ref[...] = jax.nn.sigmoid(inv * inv_a - b).astype(out_ref.dtype)


def _decode(z_rows, z_cols, a, b, T, limit):
    Pr, Pc = z_rows.shape[0], z_cols.shape[0]
    rn = jnp.sum(z_rows * z_rows, axis=-1, keepdims=True)        # (Pr, 1)
    cn = jnp.sum(z_cols * z_cols, axis=-1, keepdims=True).T      # (1, Pc)
    z_colsT = z_cols.T                                           # (16, Pc) lane-dense
    out_dtype = _DECODE_OUT_DTYPE
    ce = pl.CostEstimate(
        flops=2 * Pr * Pc * hidden2_dim + 10 * Pr * Pc,
        transcendentals=3 * Pr * Pc,
        bytes_accessed=Pr * Pc * jnp.dtype(out_dtype).itemsize
        + 4 * (Pr + Pc) * (hidden2_dim + 1),
    )
    return pl.pallas_call(
        _decode_kernel,
        out_shape=jax.ShapeDtypeStruct((Pr, Pc), out_dtype),
        grid=(Pr // T, Pc // T),
        in_specs=[_smem(), _smem(),
                  pl.BlockSpec((T, hidden2_dim), lambda i, j: (i, 0)),
                  pl.BlockSpec((hidden2_dim, T), lambda i, j: (0, j)),
                  pl.BlockSpec((T, 1), lambda i, j: (i, 0)),
                  pl.BlockSpec((1, T), lambda i, j: (0, j))],
        out_specs=pl.BlockSpec((T, T), lambda i, j: (i, j)),
        compiler_params=pltpu.CompilerParams(
            dimension_semantics=("parallel", "parallel"),
            vmem_limit_bytes=limit),
        cost_estimate=ce,
    )(a, b, z_rows, z_colsT, rn, cn)


# ---------------------------------------------------------------------------
# Parameter init (deterministic, mirrors shapes in Recommendation.__init__)
# ---------------------------------------------------------------------------
def glorot_init(key, input_dim, output_dim):
    init_range = jnp.sqrt(6.0 / (input_dim + output_dim))
    return jax.random.uniform(key, (input_dim, output_dim), jnp.float32,
                              -init_range, init_range)


def init_params(key, graph_dim, bipartite_dim, n_nodes):
    keys = jax.random.split(key, 8)
    adj = jax.random.uniform(keys[0], (n_nodes, n_nodes), jnp.float32)
    adj = (adj + adj.T) * 0.5 / n_nodes
    return dict(
        adj=adj,
        W1=glorot_init(keys[1], graph_dim, hidden1_dim),
        Wm=glorot_init(keys[2], hidden1_dim, hidden2_dim),
        Ws=glorot_init(keys[3], hidden1_dim, hidden2_dim),
        # nn.Linear weights stored pre-transposed as (in, out); bias as (1, out)
        l1_w=glorot_init(keys[4], bipartite_dim, hidden1_dim),
        l1_b=jnp.zeros((1, hidden1_dim), jnp.float32),
        l2_w=glorot_init(keys[5], hidden1_dim, hidden2_dim),
        l2_b=jnp.zeros((1, hidden2_dim), jnp.float32),
        weight=glorot_init(keys[6], bipartite_dim, hidden2_dim),
        a=jnp.array([0.8], jnp.float32),
        b=jnp.array([7.0], jnp.float32),
    )


# ---------------------------------------------------------------------------
# Full forward pass (= Recommendation.forward)
# ---------------------------------------------------------------------------
def _pad_rows(x, P):
    n = x.shape[0]
    if n == P:
        return x
    return jnp.zeros((P,) + x.shape[1:], x.dtype).at[:n].set(x)


@jax.jit
def recommendation_forward(X, bi_networks, params, noise_c, noise_t):
    N = X.shape[0]
    M = bi_networks.shape[0]
    assert N <= M, "bipartite_decode requires n_nodes <= bi_networks.shape[0]"

    limit = _vmem_limit_bytes()
    Tn, Pn = _decode_tile(N)        # A_pred padded size / tile
    Tm, Pm = _decode_tile(M)        # bi_pred padded size / tile (Pm >= Pn since N <= M)
    Tr = _encoder_row_tile(Pn, limit)

    bf16 = jnp.bfloat16
    adj = params["adj"].astype(bf16)
    adj_p = adj if Pn == N else jnp.zeros((Pn, Pn), bf16).at[:N, :N].set(adj)
    Wms = jnp.concatenate([params["Wm"], params["Ws"]], axis=1).astype(bf16)   # (32, 32)

    # NOTE: padded rows of Z_c / Z_t come out exactly zero only because noise_c, noise_t
    # and `weight` are zero-padded below; that zero-fill is what reproduces the
    # reference's zero-initialized Z_c_ in bipartite_decode.
    XW1, Zt = _prep(
        _pad_rows(X.astype(bf16), Pn), params["W1"].astype(bf16),
        _pad_rows(bi_networks.astype(bf16), Pm),
        params["l1_w"].astype(bf16), params["l1_b"],
        params["l2_w"].astype(bf16), params["l2_b"],
        _pad_rows(params["weight"], Pm), _pad_rows(noise_t, Pm), limit)

    HW = _gcn_pass_a(adj_p, XW1, Wms, Tr, limit)                     # (Pn, 32) bf16
    Zc = _gcn_pass_b(adj_p, HW, _pad_rows(noise_c, Pn), Tr, limit)   # (Pn, 16) f32

    a, b = params["a"], params["b"]
    A_full = _decode(Zc, Zc, a, b, Tn, limit)                        # (Pn, Pn)
    Zc_m = _pad_rows(Zc, Pm)            # zero rows beyond N == reference's Z_c_
    bi_full = _decode(Zc_m, Zt, a, b, Tm, limit)                     # (Pm, Pm)

    return (A_full[:N, :N].astype(jnp.float32),
            bi_full[:M, :M].astype(jnp.float32))


if __name__ == "__main__":
    # Small shapes consistent with the module:
    #   X: (n_nodes, graph_dim), adj: (n_nodes, n_nodes),
    #   bi_networks: (bipartite_dim, bipartite_dim).
    n_nodes, graph_dim, bipartite_dim = 8, 16, 8

    root = jax.random.PRNGKey(0)
    k_param, k_x, k_bi, k_nc, k_nt = jax.random.split(root, 5)

    params = init_params(k_param, graph_dim, bipartite_dim, n_nodes)
    X = jax.random.normal(k_x, (n_nodes, graph_dim), jnp.float32)
    bi_networks = (jax.random.uniform(k_bi, (bipartite_dim, bipartite_dim),
                                      jnp.float32) > 0.5).astype(jnp.float32)
    # torch.randn gaussian noise -> deterministic normal samples here
    noise_c = jax.random.normal(k_nc, (n_nodes, hidden2_dim), jnp.float32)
    noise_t = jax.random.normal(k_nt, (bipartite_dim, hidden2_dim), jnp.float32)

    A_pred, bi_pred = recommendation_forward(X, bi_networks, params, noise_c, noise_t)
    jax.block_until_ready((A_pred, bi_pred))

    assert A_pred.shape == (n_nodes, n_nodes)
    assert bi_pred.shape == (bipartite_dim, bipartite_dim)
    assert jnp.all(jnp.isfinite(A_pred)) and jnp.all(jnp.isfinite(bi_pred))
    print("KERNEL_OK")
</pallas_src>

<mosaic_0001>
module attributes {stable_mosaic.version = 11 : i64} {
  func.func @_gcn_reparam_kernel(%arg0: i32, %arg1: memref<8x8xbf16, #tpu.memory_space<vmem>>, %arg2: memref<8x32xbf16, #tpu.memory_space<vmem>>, %arg3: memref<8x16xf32, #tpu.memory_space<vmem>>, %arg4: memref<8x16xf32, #tpu.memory_space<vmem>>) attributes {dimension_semantics = [#tpu.dimension_semantics<parallel>], iteration_bounds = array<i64: 1>, scalar_prefetch = 0 : i64, scratch_operands = 0 : i64, tpu.core_type = #tpu.core_type<tc>, window_params = [{transform_indices = @transform_0, window_bounds = array<i64: 8, 8>}, {pipeline_mode = #tpu.pipeline_mode<synchronous>, transform_indices = @transform_1, window_bounds = array<i64: 8, 32>}, {transform_indices = @transform_2, window_bounds = array<i64: 8, 16>}, {transform_indices = @transform_3, window_bounds = array<i64: 8, 16>}]} {
    %c0 = arith.constant 0 : index
    %c0_0 = arith.constant 0 : index
    %0 = vector.load %arg1[%c0, %c0_0] : memref<8x8xbf16, #tpu.memory_space<vmem>>, vector<8x8xbf16>
    %c0_1 = arith.constant 0 : index
    %c0_2 = arith.constant 0 : index
    %1 = vector.load %arg2[%c0_1, %c0_2] : memref<8x32xbf16, #tpu.memory_space<vmem>>, vector<8x32xbf16>
    %cst = arith.constant dense<0.000000e+00> : vector<8x32xf32>
    %2 = tpu.matmul %0, %1, %cst {dimension_numbers = #tpu.dot_dimension_numbers<[1], [0], [0], [1], [0, 0, 1, 1], [], []>} : vector<8x8xbf16>, vector<8x32xbf16>, vector<8x32xf32> -> vector<8x32xf32>
    %3 = vector.extract_strided_slice %2 {offsets = [0, 0], sizes = [8, 16], strides = [1, 1]} : vector<8x32xf32> to vector<8x16xf32>
    %4 = vector.extract_strided_slice %2 {offsets = [0, 16], sizes = [8, 16], strides = [1, 1]} : vector<8x32xf32> to vector<8x16xf32>
    %c0_3 = arith.constant 0 : index
    %c0_4 = arith.constant 0 : index
    %5 = vector.load %arg3[%c0_3, %c0_4] : memref<8x16xf32, #tpu.memory_space<vmem>>, vector<8x16xf32>
    %6 = math.exp %4 : vector<8x16xf32>
    %7 = arith.mulf %5, %6 : vector<8x16xf32>
    %8 = arith.addf %7, %3 : vector<8x16xf32>
    %c0_5 = arith.constant 0 : index
    %c0_6 = arith.constant 0 : index
    %9 = vector.load %arg4[%c0_5, %c0_6] : memref<8x16xf32, #tpu.memory_space<vmem>>, vector<8x16xf32>
    tpu.vector_store %arg4[%c0_5, %c0_6], %8 {strides = array<i32>} : memref<8x16xf32, #tpu.memory_space<vmem>>, vector<8x16xf32>,
    return
  }
  func.func @transform_0(%arg0: i32) -> (i32, i32) {
    %c0_i32 = arith.constant 0 : i32
    %c0_i32_0 = arith.constant 0 : i32
    return %arg0, %c0_i32 : i32, i32
  }
  func.func @transform_1(%arg0: i32) -> (i32, i32) {
    %c0_i32 = arith.constant 0 : i32
    %c0_i32_0 = arith.constant 0 : i32
    %c0_i32_1 = arith.constant 0 : i32
    return %c0_i32, %c0_i32_0 : i32, i32
  }
  func.func @transform_2(%arg0: i32) -> (i32, i32) {
    %c0_i32 = arith.constant 0 : i32
    %c0_i32_0 = arith.constant 0 : i32
    return %arg0, %c0_i32 : i32, i32
  }
  func.func @transform_3(%arg0: i32) -> (i32, i32) {
    %c0_i32 = arith.constant 0 : i32
    %c0_i32_0 = arith.constant 0 : i32
    return %arg0, %c0_i32 : i32, i32
  }
}

module attributes {stable_mosaic.version = 11 : i64} {
  func.func @_prep_kernel(%arg0: memref<8x16xbf16, #tpu.memory_space<vmem>>, %arg1: memref<16x32xbf16, #tpu.memory_space<vmem>>, %arg2: memref<8x8xbf16, #tpu.memory_space<vmem>>, %arg3: memref<8x32xbf16, #tpu.memory_space<vmem>>, %arg4: memref<1x32xf32, #tpu.memory_space<vmem>>, %arg5: memref<32x16xbf16, #tpu.memory_space<vmem>>, %arg6: memref<1x16xf32, #tpu.memory_space<vmem>>, %arg7: memref<8x16xf32, #tpu.memory_space<vmem>>, %arg8: memref<8x16xf32, #tpu.memory_space<vmem>>, %arg9: memref<8x32xbf16, #tpu.memory_space<vmem>>, %arg10: memref<8x16xf32, #tpu.memory_space<vmem>>) attributes {dimension_semantics = [], scalar_prefetch = 0 : i64, scratch_operands = 0 : i64, tpu.core_type = #tpu.core_type<tc>} {
    %c0 = arith.constant 0 : index
    %c0_0 = arith.constant 0 : index
    %0 = vector.load %arg0[%c0, %c0_0] : memref<8x16xbf16, #tpu.memory_space<vmem>>, vector<8x16xbf16>
    %c0_1 = arith.constant 0 : index
    %c0_2 = arith.constant 0 : index
    %1 = vector.load %arg1[%c0_1, %c0_2] : memref<16x32xbf16, #tpu.memory_space<vmem>>, vector<16x32xbf16>
    %cst = arith.constant dense<0.000000e+00> : vector<8x32xf32>
    %2 = tpu.matmul %0, %1, %cst {dimension_numbers = #tpu.dot_dimension_numbers<[1], [0], [0], [1], [0, 0, 1, 1], [], []>} : vector<8x16xbf16>, vector<16x32xbf16>, vector<8x32xf32> -> vector<8x32xf32>
    %3 = arith.truncf %2 : vector<8x32xf32> to vector<8x32xbf16>
    %c0_3 = arith.constant 0 : index
    %c0_4 = arith.constant 0 : index
    %4 = vector.load %arg9[%c0_3, %c0_4] : memref<8x32xbf16, #tpu.memory_space<vmem>>, vector<8x32xbf16>
    tpu.vector_store %arg9[%c0_3, %c0_4], %3 {strides = array<i32>} : memref<8x32xbf16, #tpu.memory_space<vmem>>, vector<8x32xbf16>,
    %c0_5 = arith.constant 0 : index
    %c0_6 = arith.constant 0 : index
    %5 = vector.load %arg2[%c0_5, %c0_6] : memref<8x8xbf16, #tpu.memory_space<vmem>>, vector<8x8xbf16>
    %c0_7 = arith.constant 0 : index
    %c0_8 = arith.constant 0 : index
    %6 = vector.load %arg3[%c0_7, %c0_8] : memref<8x32xbf16, #tpu.memory_space<vmem>>, vector<8x32xbf16>
    %cst_9 = arith.constant dense<0.000000e+00> : vector<8x32xf32>
    %7 = tpu.matmul %5, %6, %cst_9 {dimension_numbers = #tpu.dot_dimension_numbers<[1], [0], [0], [1], [0, 0, 1, 1], [], []>} : vector<8x8xbf16>, vector<8x32xbf16>, vector<8x32xf32> -> vector<8x32xf32>
    %c0_10 = arith.constant 0 : index
    %c0_11 = arith.constant 0 : index
    %8 = vector.load %arg4[%c0_10, %c0_11] : memref<1x32xf32, #tpu.memory_space<vmem>>, vector<1x32xf32>
    %9 = vector.broadcast %8 : vector<1x32xf32> to vector<8x32xf32>
    %10 = arith.addf %7, %9 : vector<8x32xf32>
    %11 = arith.negf %10 : vector<8x32xf32>
    %12 = math.exp %11 : vector<8x32xf32>
    %cst_12 = arith.constant 1.000000e+00 : f32
    %13 = vector.broadcast %cst_12 : f32 to vector<8x32xf32>
    %14 = arith.addf %13, %12 : vector<8x32xf32>
    %15 = arith.divf %13, %14 : vector<8x32xf32>
    %16 = arith.truncf %15 : vector<8x32xf32> to vector<8x32xbf16>
    %c0_13 = arith.constant 0 : index
    %c0_14 = arith.constant 0 : index
    %17 = vector.load %arg5[%c0_13, %c0_14] : memref<32x16xbf16, #tpu.memory_space<vmem>>, vector<32x16xbf16>
    %cst_15 = arith.constant dense<0.000000e+00> : vector<8x16xf32>
    %18 = tpu.matmul %16, %17, %cst_15 {dimension_numbers = #tpu.dot_dimension_numbers<[1], [0], [0], [1], [0, 0, 1, 1], [], []>} : vector<8x32xbf16>, vector<32x16xbf16>, vector<8x16xf32> -> vector<8x16xf32>
    %c0_16 = arith.constant 0 : index
    %c0_17 = arith.constant 0 : index
    %19 = vector.load %arg6[%c0_16, %c0_17] : memref<1x16xf32, #tpu.memory_space<vmem>>, vector<1x16xf32>
    %20 = vector.broadcast %19 : vector<1x16xf32> to vector<8x16xf32>
    %21 = arith.addf %18, %20 : vector<8x16xf32>
    %c0_18 = arith.constant 0 : index
    %c0_19 = arith.constant 0 : index
    %22 = vector.load %arg7[%c0_18, %c0_19] : memref<8x16xf32, #tpu.memory_space<vmem>>, vector<8x16xf32>
    %23 = arith.mulf %22, %21 : vector<8x16xf32>
    %cst_20 = arith.constant 0.000000e+00 : f32
    %24 = vector.broadcast %cst_20 : f32 to vector<8x16xf32>
    %25 = arith.maximumf %23, %24 : vector<8x16xf32>
    %c0_21 = arith.constant 0 : index
    %c0_22 = arith.constant 0 : index
    %26 = vector.load %arg8[%c0_21, %c0_22] : memref<8x16xf32, #tpu.memory_space<vmem>>, vector<8x16xf32>
    %27 = math.exp %25 : vector<8x16xf32>
    %28 = arith.mulf %26, %27 : vector<8x16xf32>
    %29 = arith.addf %28, %25 : vector<8x16xf32>
    %c0_23 = arith.constant 0 : index
    %c0_24 = arith.constant 0 : index
    %30 = vector.load %arg10[%c0_23, %c0_24] : memref<8x16xf32, #tpu.memory_space<vmem>>, vector<8x16xf32>
    tpu.vector_store %arg10[%c0_23, %c0_24], %29 {strides = array<i32>} : memref<8x16xf32, #tpu.memory_space<vmem>>, vector<8x16xf32>,
    return
  }
}

module attributes {stable_mosaic.version = 11 : i64} {
  func.func @_gcn_hw_kernel(%arg0: i32, %arg1: memref<8x8xbf16, #tpu.memory_space<vmem>>, %arg2: memref<8x32xbf16, #tpu.memory_space<vmem>>, %arg3: memref<32x32xbf16, #tpu.memory_space<vmem>>, %arg4: memref<8x32xbf16, #tpu.memory_space<vmem>>) attributes {dimension_semantics = [#tpu.dimension_semantics<parallel>], iteration_bounds = array<i64: 1>, scalar_prefetch = 0 : i64, scratch_operands = 0 : i64, tpu.core_type = #tpu.core_type<tc>, window_params = [{transform_indices = @transform_0, window_bounds = array<i64: 8, 8>}, {pipeline_mode = #tpu.pipeline_mode<synchronous>, transform_indices = @transform_1, window_bounds = array<i64: 8, 32>}, {pipeline_mode = #tpu.pipeline_mode<synchronous>, transform_indices = @transform_2, window_bounds = array<i64: 32, 32>}, {transform_indices = @transform_3, window_bounds = array<i64: 8, 32>}]} {
    %c0 = arith.constant 0 : index
    %c0_0 = arith.constant 0 : index
    %0 = vector.load %arg1[%c0, %c0_0] : memref<8x8xbf16, #tpu.memory_space<vmem>>, vector<8x8xbf16>
    %c0_1 = arith.constant 0 : index
    %c0_2 = arith.constant 0 : index
    %1 = vector.load %arg2[%c0_1, %c0_2] : memref<8x32xbf16, #tpu.memory_space<vmem>>, vector<8x32xbf16>
    %cst = arith.constant dense<0.000000e+00> : vector<8x32xf32>
    %2 = tpu.matmul %0, %1, %cst {dimension_numbers = #tpu.dot_dimension_numbers<[1], [0], [0], [1], [0, 0, 1, 1], [], []>} : vector<8x8xbf16>, vector<8x32xbf16>, vector<8x32xf32> -> vector<8x32xf32>
    %3 = arith.truncf %2 : vector<8x32xf32> to vector<8x32xbf16>
    %c0_3 = arith.constant 0 : index
    %c0_4 = arith.constant 0 : index
    %4 = vector.load %arg3[%c0_3, %c0_4] : memref<32x32xbf16, #tpu.memory_space<vmem>>, vector<32x32xbf16>
    %cst_5 = arith.constant dense<0.000000e+00> : vector<8x32xf32>
    %5 = tpu.matmul %3, %4, %cst_5 {dimension_numbers = #tpu.dot_dimension_numbers<[1], [0], [0], [1], [0, 0, 1, 1], [], []>} : vector<8x32xbf16>, vector<32x32xbf16>, vector<8x32xf32> -> vector<8x32xf32>
    %6 = arith.truncf %5 : vector<8x32xf32> to vector<8x32xbf16>
    %c0_6 = arith.constant 0 : index
    %c0_7 = arith.constant 0 : index
    %7 = vector.load %arg4[%c0_6, %c0_7] : memref<8x32xbf16, #tpu.memory_space<vmem>>, vector<8x32xbf16>
    tpu.vector_store %arg4[%c0_6, %c0_7], %6 {strides = array<i32>} : memref<8x32xbf16, #tpu.memory_space<vmem>>, vector<8x32xbf16>,
    return
  }
  func.func @transform_0(%arg0: i32) -> (i32, i32) {
    %c0_i32 = arith.constant 0 : i32
    %c0_i32_0 = arith.constant 0 : i32
    return %arg0, %c0_i32 : i32, i32
  }
  func.func @transform_1(%arg0: i32) -> (i32, i32) {
    %c0_i32 = arith.constant 0 : i32
    %c0_i32_0 = arith.constant 0 : i32
    %c0_i32_1 = arith.constant 0 : i32
    return %c0_i32, %c0_i32_0 : i32, i32
  }
  func.func @transform_2(%arg0: i32) -> (i32, i32) {
    %c0_i32 = arith.constant 0 : i32
    %c0_i32_0 = arith.constant 0 : i32
    %c0_i32_1 = arith.constant 0 : i32
    return %c0_i32, %c0_i32_0 : i32, i32
  }
  func.func @transform_3(%arg0: i32) -> (i32, i32) {
    %c0_i32 = arith.constant 0 : i32
    %c0_i32_0 = arith.constant 0 : i32
    return %arg0, %c0_i32 : i32, i32
  }
}

module attributes {stable_mosaic.version = 11 : i64} {
  func.func @_decode_kernel(%arg0: i32, %arg1: i32, %arg2: memref<1xf32, #tpu.memory_space<smem>>, %arg3: memref<1xf32, #tpu.memory_space<smem>>, %arg4: memref<8x16xf32, #tpu.memory_space<vmem>>, %arg5: memref<16x8xf32, #tpu.memory_space<vmem>>, %arg6: memref<8x1xf32, #tpu.memory_space<vmem>>, %arg7: memref<1x8xf32, #tpu.memory_space<vmem>>, %arg8: memref<8x8xf32, #tpu.memory_space<vmem>>) attributes {dimension_semantics = [#tpu.dimension_semantics<parallel>, #tpu.dimension_semantics<parallel>], iteration_bounds = array<i64: 1, 1>, scalar_prefetch = 0 : i64, scratch_operands = 0 : i64, tpu.core_type = #tpu.core_type<tc>, window_params = [{transform_indices = @transform_0, window_bounds = array<i64: 1>}, {transform_indices = @transform_1, window_bounds = array<i64: 1>}, {transform_indices = @transform_2, window_bounds = array<i64: 8, 16>}, {transform_indices = @transform_3, window_bounds = array<i64: 16, 8>}, {transform_indices = @transform_4, window_bounds = array<i64: 8, 1>}, {transform_indices = @transform_5, window_bounds = array<i64: 1, 8>}, {transform_indices = @transform_6, window_bounds = array<i64: 8, 8>}]} {
    %c0 = arith.constant 0 : index
    %0 = memref.load %arg2[%c0] : memref<1xf32, #tpu.memory_space<smem>>
    %cst = arith.constant 1.000000e+00 : f32
    %1 = arith.divf %cst, %0 : f32
    %c0_0 = arith.constant 0 : index
    %2 = memref.load %arg3[%c0_0] : memref<1xf32, #tpu.memory_space<smem>>
    %c0_1 = arith.constant 0 : index
    %c0_2 = arith.constant 0 : index
    %3 = vector.load %arg4[%c0_1, %c0_2] : memref<8x16xf32, #tpu.memory_space<vmem>>, vector<8x16xf32>
    %c0_3 = arith.constant 0 : index
    %c0_4 = arith.constant 0 : index
    %4 = vector.load %arg5[%c0_3, %c0_4] : memref<16x8xf32, #tpu.memory_space<vmem>>, vector<16x8xf32>
    %cst_5 = arith.constant dense<0.000000e+00> : vector<8x8xf32>
    %5 = tpu.matmul %3, %4, %cst_5 {dimension_numbers = #tpu.dot_dimension_numbers<[1], [0], [0], [1], [0, 0, 1, 1], [], []>} : vector<8x16xf32>, vector<16x8xf32>, vector<8x8xf32> -> vector<8x8xf32>
    %c0_6 = arith.constant 0 : index
    %c0_7 = arith.constant 0 : index
    %6 = vector.load %arg6[%c0_6, %c0_7] : memref<8x1xf32, #tpu.memory_space<vmem>>, vector<8x1xf32>
    %c0_8 = arith.constant 0 : index
    %c0_9 = arith.constant 0 : index
    %7 = vector.load %arg7[%c0_8, %c0_9] : memref<1x8xf32, #tpu.memory_space<vmem>>, vector<1x8xf32>
    %8 = vector.broadcast %6 : vector<8x1xf32> to vector<8x8xf32>
    %9 = vector.broadcast %7 : vector<1x8xf32> to vector<8x8xf32>
    %10 = arith.addf %8, %9 : vector<8x8xf32>
    %cst_10 = arith.constant 2.000000e+00 : f32
    %11 = vector.broadcast %cst_10 : f32 to vector<8x8xf32>
    %12 = arith.mulf %11, %5 : vector<8x8xf32>
    %13 = arith.subf %10, %12 : vector<8x8xf32>
    %cst_11 = arith.constant 0.000000e+00 : f32
    %14 = vector.broadcast %cst_11 : f32 to vector<8x8xf32>
    %15 = arith.maximumf %13, %14 : vector<8x8xf32>
    %16 = math.sqrt %15 : vector<8x8xf32>
    %cst_12 = arith.constant 9.99999974E-6 : f32
    %17 = vector.broadcast %cst_12 : f32 to vector<8x8xf32>
    %18 = arith.addf %16, %17 : vector<8x8xf32>
    %19 = tpu.reciprocal %18 {approx = true} : vector<8x8xf32> -> vector<8x8xf32>
    %20 = vector.broadcast %1 : f32 to vector<8x8xf32>
    %21 = arith.mulf %19, %20 : vector<8x8xf32>
    %22 = vector.broadcast %2 : f32 to vector<8x8xf32>
    %23 = arith.subf %21, %22 : vector<8x8xf32>
    %24 = arith.negf %23 : vector<8x8xf32>
    %25 = math.exp %24 : vector<8x8xf32>
    %cst_13 = arith.constant 1.000000e+00 : f32
    %26 = vector.broadcast %cst_13 : f32 to vector<8x8xf32>
    %27 = arith.addf %26, %25 : vector<8x8xf32>
    %28 = arith.divf %26, %27 : vector<8x8xf32>
    %c0_14 = arith.constant 0 : index
    %c0_15 = arith.constant 0 : index
    %29 = vector.load %arg8[%c0_14, %c0_15] : memref<8x8xf32, #tpu.memory_space<vmem>>, vector<8x8xf32>
    tpu.vector_store %arg8[%c0_14, %c0_15], %28 {strides = array<i32>} : memref<8x8xf32, #tpu.memory_space<vmem>>, vector<8x8xf32>,
    return
  }
  func.func @transform_0(%arg0: i32, %arg1: i32) -> i32 {
    %c0_i32 = arith.constant 0 : i32
    %c0_i32_0 = arith.constant 0 : i32
    return %c0_i32 : i32
  }
  func.func @transform_1(%arg0: i32, %arg1: i32) -> i32 {
    %c0_i32 = arith.constant 0 : i32
    %c0_i32_0 = arith.constant 0 : i32
    return %c0_i32 : i32
  }
  func.func @transform_2(%arg0: i32, %arg1: i32) -> (i32, i32) {
    %c0_i32 = arith.constant 0 : i32
    %c0_i32_0 = arith.constant 0 : i32
    return %arg0, %c0_i32 : i32, i32
  }
  func.func @transform_3(%arg0: i32, %arg1: i32) -> (i32, i32) {
    %c0_i32 = arith.constant 0 : i32
    %c0_i32_0 = arith.constant 0 : i32
    return %c0_i32, %arg1 : i32, i32
  }
  func.func @transform_4(%arg0: i32, %arg1: i32) -> (i32, i32) {
    %c0_i32 = arith.constant 0 : i32
    %c0_i32_0 = arith.constant 0 : i32
    return %arg0, %c0_i32 : i32, i32
  }
  func.func @transform_5(%arg0: i32, %arg1: i32) -> (i32, i32) {
    %c0_i32 = arith.constant 0 : i32
    %c0_i32_0 = arith.constant 0 : i32
    return %c0_i32, %arg1 : i32, i32
  }
  func.func @transform_6(%arg0: i32, %arg1: i32) -> (i32, i32) {
    %c0_i32 = arith.constant 0 : i32
    return %arg0, %arg1 : i32, i32
  }
}

</mosaic_0001>

<bundles_post_ra>
// kernel: recommendation_forward.5
= control target key start
LH: loop header
LB: loop body
LE: loop exit
PB: predicated region body
PF: predicated region fallthrough
CT: control target
= control target key end

     0   :  { %vm74_vm0 = vcmask 1043456   ;;  %vm70_vm1 = vcmask 64512   ;;  %vm44_vm2 = vcmask 130048   ;;  %vm131_vm7 = vcmask 261120   ;;  %s285_s3 = inlined_call_operand.vmem [shape: bf16[8,32], index: 3, kind: input, shape index: {}]   ;;  %s286_s2 = inlined_call_operand.vmem [shape: bf16[8,8], index: 2, kind: input, shape index: {}]   ;;  %s287_s4 = inlined_call_operand.vmem [shape: f32[1,32], index: 4, kind: input, shape index: {}]   ;;  %s288_s6 = inlined_call_operand.vmem [shape: f32[1,16], index: 6, kind: input, shape index: {}]   ;;  %s289_s5 = inlined_call_operand.vmem [shape: bf16[32,16], index: 5, kind: input, shape index: {}]   ;;  %s290_s1 = inlined_call_operand.vmem [shape: bf16[16,32], index: 1, kind: input, shape index: {}]   ;;  %s291_s0 = inlined_call_operand.vmem [shape: bf16[8,16], index: 0, kind: input, shape index: {}]   ;;  %s292_s9 = inlined_call_operand.vmem [shape: bf16[8,32], index: 9, kind: output, shape index: {0}]   ;;  %s293_s7 = inlined_call_operand.vmem [shape: f32[8,16], index: 7, kind: input, shape index: {}]   ;;  %s294_s8 = inlined_call_operand.vmem [shape: f32[8,16], index: 8, kind: input, shape index: {}]   ;;  %s295_s10 = inlined_call_operand.vmem [shape: f32[8,16], index: 10, kind: output, shape index: {1}]  }
   0x1   :  { %v65_v0 = vld [vmem:[%s285_s3] sm:$0xf]  ;;  %v183_v3 = vld [vmem:[%s289_s5 + $0x8] sm:$0xff]  ;;  %vm62_vm8 = vcmask 257024  }
   0x2   :  { %v76_v1 = vsel %vm74_vm0, %v65_v0, 0  ;;  %v64_v2 = vld [vmem:[%s286_s2] sm:$0xf]  ;;  %141 = vmatpush.bf16.msra.mxu2 %v183_v3 }
   0x3   :  { %85 = vmatpush.bf16.msra.mxu1 %v76_v1  ;;  %v182_v4 = vld [vmem:[%s289_s5] sm:$0xff] }
   0x4   :  { %v184_v5 = vld [vmem:[%s287_s4] ss:$0 sm:$0xff] }
   0x5   :  { %v181_v8 = vld [vmem:[%s290_s1] sm:$0xff] }
   0x6   :  { %170 = vmatmul.msk.bf16.vlgmr.msra.gmra.mxu1 %vm70_vm1, %v64_v2  ;;  %142 = vmatpush.bf16.msra.mxu2 %v182_v4  ;;  %v35_v10 = vld [vmem:[%s291_s0] sm:$0xf] }
   0x7   :  { %55 = vmatpush.bf16.msra.mxu0 %v181_v8  ;;  %v185_v28 = vld [vmem:[%s288_s6] ss:$0 sm:$0xff] }
   0x8   :  { %v148_v30 = vld [vmem:[%s293_s7] sm:$0xff] }
   0x9   :  { %v151_v36 = vld [vmem:[%s294_s8] sm:$0xff] }
   0xa   :  { %169 = vmatmul.msk.bf16.vlgmr.msra.gmra.mxu0 %vm44_vm2, %v35_v10 }
  0x83   :  { %v87_v6 = vpop.f32.mrf.mxu1 }
  0x84   :  { %v88_v7 = vadd.f32 %v184_v5, %v87_v6 }
  0x86   :  { %v171_v9 = vmul.f32 -1.442695, %v88_v7 }
  0x87   :  { %v57_v25 = vpop.f32.mrf.mxu0 }
  0x88   :  { %186 = vpow2.f32 %v171_v9  ;;  %v61_v27 = vpack.c.bf16 %v57_v25, %v57_v25 }
  0x8a   :  { %63 = vst.msk [vmem:[%s292_s9] sm:$0xf] %vm62_vm8, %v61_v27 }
  0x8b   :  { %v89_v11 = vpop.f32.mrf.mxu1 }
  0x8e   :  { %v187_v12 = vpop.eup %186 }
  0x8f   :  { %v94_v13 = vadd.f32 1.0, %v187_v12  ;;  %v59_v26 = vpop.f32.mrf.mxu0 }
  0x91   :  { %188 = vrcp.f32 %v94_v13  ;;  %v106_v17 = vand.u32 2147483648, %v94_v13  ;;  %v104_v19 = vand.u32 2147483647, %v94_v13  ;;  %vm100_vm4 = vweird.f32 %v94_v13 }
  0x93   :  { %v107_v21 = vor.u32 1.1754944e-38, %v106_v17  ;;  %vm105_vm6 = vcmp.eq.f32.partialorder %v104_v19, 8.507059e+37 }
  0x97   :  { %v189_v14 = vpop.eup %188 }
  0x98   :  { %v96_v15 = vmul.f32 %v189_v14, %v94_v13  ;;  %vm101_vm3 = vweird.f32 %v189_v14 }
  0x99   :  { %vm102_vm5 = vmor %vm100_vm4, %vm101_vm3 }
  0x9a   :  { %v97_v16 = vsub.f32 1.0, %v96_v15 }
  0x9c   :  { %v98_v18 = vmul.f32 %v189_v14, %v97_v16 }
  0x9e   :  { %v99_v20 = vadd.f32 %v189_v14, %v98_v18 }
  0xa0   :  { %v103_v22 = vsel %vm102_vm5, %v189_v14, %v99_v20 }
  0xa1   :  { %v108_v23 = vsel %vm105_vm6, %v107_v21, %v103_v22 }
  0xa2   :  { %v110_v24 = vpack.c.bf16 %v108_v23, %v108_v23 }
  0xa4   :  { %180 = vmatmul.msk.bf16.vlgmr.msra.gmra.mxu2 %vm131_vm7, %v110_v24 }
 0x127   :  { %v144_v29 = vpop.f32.mrf.mxu2 }
 0x128   :  { %v145_v31 = vadd.f32 %v185_v28, %v144_v29 }
 0x12a   :  { %v149_v32 = vmul.f32 %v148_v30, %v145_v31 }
 0x12c   :  { %v150_v33 = vmax.f32 %v149_v32, 0.0 }
 0x12e   :  { %v152_v34 = vmul.f32 1.442695, %v150_v33 }
 0x12f   :  { %v146_v35 = vpop.f32.mrf.mxu2 }
 0x130   :  { %190 = vpow2.f32 %v152_v34 }
 0x136   :  { %v191_v37 = vpop.eup %190 }
 0x137   :  { %v154_v38 = vmul.f32 %v191_v37, %v151_v36 }
 0x139   :  { %v155_v39 = vadd.f32 %v154_v38, %v150_v33 }
 0x13b   :  { %156 = vst.msk [vmem:[%s295_s10] sm:$0xff] %vm44_vm2, %v155_v39 }

// kernel: recommendation_forward.6
= control target key start
LH: loop header
LB: loop body
LE: loop exit
PB: predicated region body
PF: predicated region fallthrough
CT: control target
= control target key end

     0   :  { %vm21_vm0 = vcmask 1043456   ;;  %vm17_vm1 = vcmask 64512   ;;  %vm55_vm2 = vcmask 261120   ;;  %vm73_vm3 = vcmask 257024   ;;  %s126_s1 = inlined_call_operand.vmem [shape: bf16[8,32], index: 1, kind: input, shape index: {}]   ;;  %s127_s0 = inlined_call_operand.vmem [shape: bf16[8,8], index: 0, kind: input, shape index: {}]   ;;  %s128_s2 = inlined_call_operand.vmem [shape: bf16[32,32], index: 2, kind: input, shape index: {}]   ;;  %s129_s3 = inlined_call_operand.vmem [shape: bf16[8,32], index: 3, kind: output, shape index: {}]  }
   0x1   :  { %v16_v0 = vld [vmem:[%s126_s1] sm:$0xf]  ;;  %v90_v1 = vld [vmem:[%s128_s2 + $0x8] sm:$0xff] }
   0x2   :  { %v23_v2 = vsel %vm21_vm0, %v16_v0, 0  ;;  %v15_v3 = vld [vmem:[%s127_s0] sm:$0xf]  ;;  %65 = vmatpush.bf16.msra.mxu1 %v90_v1 }
   0x3   :  { %32 = vmatpush.bf16.msra.mxu0 %v23_v2  ;;  %v89_v4 = vld [vmem:[%s128_s2] sm:$0xff] }
   0x6   :  { %79 = vmatmul.msk.bf16.vlgmr.msra.gmra.mxu0 %vm17_vm1, %v15_v3  ;;  %66 = vmatpush.bf16.msra.mxu1 %v89_v4 }
  0x83   :  { %v34_v5 = vpop.f32.mrf.mxu0 }
  0x84   :  { %v38_v6 = vpack.c.bf16 %v34_v5, %v34_v5 }
  0x86   :  { %88 = vmatmul.msk.bf16.vlgmr.msra.gmra.mxu1 %vm55_vm2, %v38_v6 }
  0x8b   :  { %v36_v7 = vpop.f32.mrf.mxu0 }
 0x103   :  { %v68_v8 = vpop.f32.mrf.mxu1 }
 0x104   :  { %v72_v9 = vpack.c.bf16 %v68_v8, %v68_v8 }
 0x106   :  { %74 = vst.msk [vmem:[%s129_s3] sm:$0xf] %vm73_vm3, %v72_v9 }
 0x10b   :  { %v70_v10 = vpop.f32.mrf.mxu1 }

// kernel: recommendation_forward.7
= control target key start
LH: loop header
LB: loop body
LE: loop exit
PB: predicated region body
PF: predicated region fallthrough
CT: control target
= control target key end

     0   :  { %vm21_vm0 = vcmask 1043456   ;;  %vm17_vm1 = vcmask 64512   ;;  %s57_s16 = smov 112   ;;  %vm47_vm2 = vcmask 130048   ;;  %s90_s1 = inlined_call_operand.vmem [shape: bf16[8,32], index: 1, kind: input, shape index: {}]   ;;  %s91_s0 = inlined_call_operand.vmem [shape: bf16[8,8], index: 0, kind: input, shape index: {}]   ;;  %s92_s2 = inlined_call_operand.vmem [shape: f32[8,16], index: 2, kind: input, shape index: {}]   ;;  %s93_s3 = inlined_call_operand.vmem [shape: f32[8,16], index: 3, kind: output, shape index: {}]  }
   0x1   :  { %v16_v0 = vld [vmem:[%s90_s1] sm:$0xf] }
   0x2   :  { %v23_v1 = vsel %vm21_vm0, %v16_v0, 0  ;;  %v15_v2 = vld [vmem:[%s91_s0] sm:$0xf] }
   0x3   :  { %32 = vmatpush.bf16.msra.mxu0 %v23_v1  ;;  %v38_v7 = vld [vmem:[%s92_s2] sm:$0xff] }
   0x6   :  { %53 = vmatmul.msk.bf16.vlgmr.msra.gmra.mxu0 %vm17_vm1, %v15_v2 }
  0x83   :  { %v34_v3 = vpop.f32.mrf.mxu0 }
  0x84   :  { %v39_v4 = vmul.f32 1.442695, %v34_v3 }
  0x86   :  { %55 = vpow2.f32 %v39_v4 }
  0x8b   :  { %v36_v5 = vpop.f32.mrf.mxu0 }
  0x8c   :  { %v56_v6 = vpop.eup %55 }
  0x8d   :  { %42 = vrot.lane.b32.xlu0 %v56_v6, %s57_s16 }
  0xff   :  { %v43_v8 = vpop.permute.xlu0 %42 }
 0x100   :  { %v45_v9 = vmul.f32 %v43_v8, %v38_v7 }
 0x102   :  { %v46_v10 = vadd.f32 %v45_v9, %v34_v3 }
 0x104   :  { %48 = vst.msk [vmem:[%s93_s3] sm:$0xff] %vm47_vm2, %v46_v10 }

// kernel: recommendation_forward.8
= control target key start
LH: loop header
LB: loop body
LE: loop exit
PB: predicated region body
PF: predicated region fallthrough
CT: control target
= control target key end

     0   :  { %vm47_vm0 = vcmask 130048   ;;  %v184_v4 = vmov 0   ;;  %s245_s0 = inlined_call_operand.<no memory space> [shape: f32[1], index: 0, kind: input, shape index: {}]   ;;  %s246_s1 = inlined_call_operand.<no memory space> [shape: f32[1], index: 1, kind: input, shape index: {}]   ;;  %s247_s2 = inlined_call_operand.vmem [shape: f32[8,16], index: 2, kind: input, shape index: {}]   ;;  %s248_s3 = inlined_call_operand.vmem [shape: f32[16,8], index: 3, kind: input, shape index: {}]   ;;  %s249_s4 = inlined_call_operand.vmem [shape: f32[8,1], index: 4, kind: input, shape index: {}]   ;;  %s250_s5 = inlined_call_operand.vmem [shape: f32[1,8], index: 5, kind: input, shape index: {}]   ;;  %s251_s6 = inlined_call_operand.hbm [shape: f32[8,8], index: 6, kind: output, shape index: {}]  }
   0x1   :  { %v46_v0 = vld [vmem:[%s248_s3 + $0x8] sm:$0xff]  ;;  %v45_v1 = vld [vmem:[%s248_s3] sm:$0xff]  ;;  %v27_v2 = vstv %s245_s0  ;;  %146 = vset.pattern.permute.xlu0 %v184_v4 }
   0x2   :  { %65 = vmatpush.msra.mxu0 %v46_v0  ;;  %v44_v3 = vld [vmem:[%s247_s2] sm:$0xff]  ;;  %148 = vrcp.f32 %v27_v2 }
   0x3   :  { %v71_v5 = vld [vmem:[%s249_s4] sm:$0xff] }
   0x4   :  { %75 = vperm.xlu0 %146, %v71_v5  }
   0x5   :  { %13 = vsyncpa [#allocation5], 0  ;;  %66 = vmatpush.msra.mxu0 %v45_v1  ;;  %v39_v8 = vand.u32 2147483648, %v27_v2  ;;  %vm33_vm1 = vweird.f32 %v27_v2  ;;  %v37_v10 = vand.u32 2147483647, %v27_v2  ;;  %v101_v36 = vstv %s246_s1  ;;  %s185_s7 = smov [#allocation4]  }
   0x6   :  { %140 = vmatmul.msk.f32.vlgmr.msra.gmra.mxu0 %vm47_vm0, %v44_v3  ;;  %v147_v16 = vld [vmem:[%s250_s5] ss:$0 sm:$0xff]  ;;  %s129_s8 = sshll.u32 %s185_s7, 4  ;;  %s131_s1 = sshll.u32 %s251_s6, 4  ;;  %vm122_vm10 = vcmask 64512   ;;  %s130_s8 = int_to_ptr.vmem [resolvable:$true] %s129_s8  ;;  %s132_s1 = int_to_ptr.hbm [resolvable:$true] %s131_s1 }
   0x7   :  { %v40_v12 = vor.u32 1.1754944e-38, %v39_v8  ;;  %vm38_vm4 = vcmp.eq.f32.partialorder %v37_v10, 8.507059e+37 }
   0x8   :  { %v149_v6 = vpop.eup %148 }
   0x9   :  { %v29_v7 = vmul.f32 %v149_v6, %v27_v2  ;;  %vm34_vm2 = vweird.f32 %v149_v6 }
   0xa   :  { %vm35_vm3 = vmor %vm33_vm1, %vm34_vm2 }
   0xb   :  { %v30_v9 = vsub.f32 1.0, %v29_v7 }
   0xd   :  { %v31_v11 = vmul.f32 %v149_v6, %v30_v9 }
   0xf   :  { %v32_v13 = vadd.f32 %v149_v6, %v31_v11 }
  0x11   :  { %v36_v14 = vsel %vm35_vm3, %v149_v6, %v32_v13 }
  0x12   :  { %v41_v15 = vsel %vm38_vm4, %v40_v12, %v36_v14 }
  0x13   :  { %142 = vpush %v41_v15 }
  0x44   :  { %s143_s3 = spop %142 }
  0x45   :  { %v99_v34 = vstv %s143_s3 }
  0x76   :  { %v76_v17 = vpop.permute.xlu0 %75 }
  0x77   :  { %v81_v18 = vadd.f32 %v147_v16, %v76_v17 }
  0x83   :  { %v68_v19 = vpop.f32.mrf.mxu0 }
  0x84   :  { %v82_v20 = vmul.f32 2.0, %v68_v19 }
  0x86   :  { %v83_v21 = vsub.f32 %v81_v18, %v82_v20 }
  0x88   :  { %v84_v22 = vmax.f32 %v83_v21, 0.0 }
  0x8a   :  { %150 = vrsqrt.f32 %v84_v22  ;;  %vm92_vm5 = vcmp.eq.f32.partialorder %v84_v22, inf  ;;  %v95_v30 = vand.u32 2147483648, %v84_v22  ;;  %vm94_vm6 = vcmp.eq.f32.partialorder %v84_v22, 0.0 }
  0x90   :  { %v151_v23 = vpop.eup %150 }
  0x91   :  { %v86_v24 = vmul.f32 %v151_v23, %v84_v22 }
  0x93   :  { %v87_v25 = vmul.f32 %v151_v23, %v86_v24 }
  0x95   :  { %v88_v26 = vmul.f32 0.5, %v87_v25 }
  0x97   :  { %v89_v27 = vsub.f32 1.5, %v88_v26 }
  0x99   :  { %v90_v28 = vmul.f32 %v151_v23, %v89_v27 }
  0x9b   :  { %v91_v29 = vmul.f32 %v90_v28, %v84_v22 }
  0x9d   :  { %v93_v31 = vsel %vm92_vm5, %v84_v22, %v91_v29 }
  0x9e   :  { %v96_v32 = vsel %vm94_vm6, %v95_v30, %v93_v31 }
  0x9f   :  { %v97_v33 = vadd.f32 1e-05, %v96_v32 }
  0xa1   :  { %152 = vrcp.f32 %v97_v33 }
  0xa7   :  { %v153_v35 = vpop.eup %152 }
  0xa8   :  { %v100_v37 = vmul.f32 %v153_v35, %v99_v34 }
  0xaa   :  { %v102_v38 = vsub.f32 %v100_v37, %v101_v36 }
  0xac   :  { %v141_v39 = vmul.f32 -1.442695, %v102_v38 }
  0xae   :  { %154 = vpow2.f32 %v141_v39 }
  0xb4   :  { %v155_v40 = vpop.eup %154 }
  0xb5   :  { %v106_v41 = vadd.f32 1.0, %v155_v40 }
  0xb7   :  { %156 = vrcp.f32 %v106_v41  ;;  %v118_v45 = vand.u32 2147483648, %v106_v41  ;;  %v116_v47 = vand.u32 2147483647, %v106_v41  ;;  %vm112_vm8 = vweird.f32 %v106_v41 }
  0xb9   :  { %v119_v49 = vor.u32 1.1754944e-38, %v118_v45  ;;  %vm117_vm11 = vcmp.eq.f32.partialorder %v116_v47, 8.507059e+37 }
  0xbd   :  { %v157_v42 = vpop.eup %156 }
  0xbe   :  { %v108_v43 = vmul.f32 %v157_v42, %v106_v41  ;;  %vm113_vm7 = vweird.f32 %v157_v42 }
  0xbf   :  { %vm114_vm9 = vmor %vm112_vm8, %vm113_vm7 }
  0xc0   :  { %v109_v44 = vsub.f32 1.0, %v108_v43 }
  0xc2   :  { %v110_v46 = vmul.f32 %v157_v42, %v109_v44 }
  0xc4   :  { %v111_v48 = vadd.f32 %v157_v42, %v110_v46 }
  0xc6   :  { %v115_v50 = vsel %vm114_vm9, %v157_v42, %v111_v48 }
  0xc7   :  { %v120_v51 = vsel %vm117_vm11, %v119_v49, %v115_v50 }
  0xc8   :  { %123 = vst.msk [vmem:[#allocation4] sm:$0xff] %vm122_vm10, %v120_v51 }
  0xc9   :  { %134 = dma.vmem_to_hbm [thread:$0]  %s130_s8, 128, %s132_s1, [#allocation5]  }
  0xca   :  { %182 = dma.done.wait [#allocation5], 128  }
  0xcb   :  { %183 = vsyncadd [#allocation5], 4294967168 }
  0xcc   :  { %139 = vsyncpa [#allocation5], 1 }

</bundles_post_ra>
